<compile_context>
chip_gen: v5e
topology: v5e:2x2
jax: 0.10.0
libtpu: 0.0.40
codegen_flags: <defaults>
</compile_context>

<pallas_src>
import numpy as np
import jax
import jax.numpy as jnp
from jax.experimental import pallas as pl
from jax.experimental.pallas import tpu as pltpu


def _make_tt_kernel(n, r, M, Bt, d):
    """Build the fused TT-chain kernel body (static config captured by closure)."""

    def kernel(*refs):
        x_ref = refs[0]                    # [r_d, Bt]              (batch-last input)
        core_refs = refs[1:1 + d]          # core 0: [r_0*n_0, r_1]; core k>=1: [n_k, r_k, r_{k+1}]
        o_ref = refs[1 + d]                # [1, r_0*n_0, M_0*Bt]   (float32)
        scratch = refs[2 + d:]             # for k = d-1 .. 1: [r_k, n_k*M_k*Bt]

        X = x_ref[...]                     # [r_d, M_{d-1}*Bt], M_{d-1} == 1
        for idx, k in enumerate(range(d - 1, 0, -1)):
            W = M[k] * Bt                  # current column width (contracted modes x batch)
            s_ref = scratch[idx]           # [r_k, n_k * W]
            c_ref = core_refs[k]           # [n_k, r_k, r_{k+1}]
            for i_n in range(n[k]):
                # einsum('ijk,lj->ilk') restricted to mode index i_n:
                #   Y[a, c] = sum_j core_k[a, i_n, j] * X[j, c]
                y = jnp.dot(c_ref[i_n], X, preferred_element_type=jnp.float32)
                if y.dtype != s_ref.dtype:
                    y = y.astype(s_ref.dtype)
                s_ref[:, i_n * W:(i_n + 1) * W] = y
            # reading scratch back IS the torch reshape [.., r_k*n_k, M] -> [.., r_k, n_k*M]
            X = s_ref[...]                 # [r_k, M_{k-1}*Bt]

        # last step (k = 0): one lane-dense matmul (the flop-dominant step)
        y = jnp.dot(core_refs[0][...], X, preferred_element_type=jnp.float32)
        if y.dtype != o_ref.dtype:
            y = y.astype(o_ref.dtype)
        o_ref[0] = y

    return kernel


def _choose_batch_tile(B, bytes_per_batch):
    """Pick batch tile Bt and tile count G.

    B <= 128: one tile covering the whole batch (block == full array, no (8,128) issue).
    Otherwise: lane-aligned (multiple-of-128) tiles sized against a ~40 MiB VMEM budget
    (safe under v7x's 64 MiB, half of v5e/v6e), keeping >= 2 tiles so the "parallel"
    grid axis can occupy both v7x TensorCores.
    """
    if B <= 128:
        return B, 1
    budget = 40 * 2 ** 20
    bt = 128
    while ((bt * 2) * bytes_per_batch <= budget and bt * 2 <= 1024
           and pl.cdiv(B, bt * 2) >= 2):
        bt *= 2
    return bt, pl.cdiv(B, bt)


def tt_forward(cores, x, n, r, *, compute_dtype=jnp.float32):
    """TTTensor.forward(input, T=False, tensorize_output=False), sample_axis=True.

    compute_dtype=jnp.bfloat16 runs the MXU in bf16 with f32 accumulation
    (loosen comparison tolerance accordingly).
    """
    # TODO(synk): T=True and input=None (sample_axis=False) forward branches, plus
    # recover/get_svds/normalize/orthogonolize/inverse_batch (torch.svd / torch.qr)
    # are not implemented here.
    B = x.shape[0]
    d = len(n)
    n = [int(v) for v in n]
    r = [int(v) for v in r]
    assert len(r) == d + 1 and x.shape[1] == r[d]

    # M[k] = prod(n[k+1:]) : already-contracted mode combinations at step k.
    M = [1] * d
    for k in range(d - 2, -1, -1):
        M[k] = M[k + 1] * n[k + 1]

    itemsize = jnp.dtype(compute_dtype).itemsize
    # per-batch-element VMEM footprint: x column + intermediates + output column
    bytes_per_batch = (itemsize * r[d]
                       + sum(itemsize * r[k] * n[k] * M[k] for k in range(1, d))
                       + 4 * r[0] * n[0] * M[0])
    Bt, G = _choose_batch_tile(B, bytes_per_batch)
    B_pad = Bt * G

    # batch-last input [r_d, B_pad]
    xt = jnp.transpose(x.astype(compute_dtype))
    if B_pad != B:
        xt = jnp.pad(xt, ((0, 0), (0, B_pad - B)))

    # Layout plumbing (tiny, done once in XLA): core 0 as its 2-D matrix; cores k>=1
    # mode-major so the kernel slices a contiguous leading-axis block per mode index.
    cores_in = [jnp.reshape(cores[0].astype(compute_dtype), (r[0] * n[0], r[1]))]
    for k in range(1, d):
        cores_in.append(jnp.transpose(cores[k].astype(compute_dtype), (1, 0, 2)))

    out_rows = r[0] * n[0]
    out_cols = M[0] * Bt

    in_specs = [pl.BlockSpec((r[d], Bt), lambda j: (0, j))]
    in_specs.append(pl.BlockSpec(cores_in[0].shape, lambda j: (0, 0)))        # resident
    for k in range(1, d):
        in_specs.append(pl.BlockSpec(cores_in[k].shape, lambda j: (0, 0, 0)))  # resident
    out_spec = pl.BlockSpec((1, out_rows, out_cols), lambda j: (j, 0, 0))
    scratch_shapes = [pltpu.VMEM((r[k], n[k] * M[k] * Bt), compute_dtype)
                      for k in range(d - 1, 0, -1)]

    flops = 2 * B_pad * sum(r[k] * n[k] * r[k + 1] * M[k] for k in range(d))
    bytes_accessed = (xt.size * itemsize
                      + sum(c.size * itemsize for c in cores_in)
                      + G * out_rows * out_cols * 4)
    cost = pl.CostEstimate(flops=flops, transcendentals=0,
                           bytes_accessed=bytes_accessed)

    # Raise the scoped-VMEM limit only when the working set needs it (cap at v7x's 64 MiB).
    vmem_need = (2 * r[d] * Bt * itemsize + 2 * out_rows * out_cols * 4
                 + 2 * sum(c.size * itemsize for c in cores_in)
                 + sum(r[k] * n[k] * M[k] * Bt * itemsize for k in range(1, d)))
    vmem_limit = None
    if vmem_need + (4 << 20) > (32 << 20):
        vmem_limit = int(min(64 << 20, vmem_need + (8 << 20)))

    out = pl.pallas_call(
        _make_tt_kernel(n, r, M, Bt, d),
        out_shape=jax.ShapeDtypeStruct((G, out_rows, out_cols), jnp.float32),
        grid=(G,),
        in_specs=in_specs,
        out_specs=out_spec,
        scratch_shapes=scratch_shapes,
        compiler_params=pltpu.CompilerParams(
            dimension_semantics=("parallel",),
            vmem_limit_bytes=vmem_limit),
        cost_estimate=cost,
    )(xt, *cores_in)

    # [G, r_0*n_0, M_0, Bt] (batch-last) -> [B, r_0*N] (flatten_torch order)
    y = out.reshape(G, out_rows, M[0], Bt)
    y = jnp.transpose(y, (0, 3, 1, 2)).reshape(B_pad, out_rows * M[0])
    return y[:B]


def tt_forward_ref(cores, x, n, r):
    """Pure-JAX reference replicating the PyTorch loop exactly."""
    B = x.shape[0]
    d = len(n)
    out = x.reshape(B, r[d], 1)
    for k in range(d - 1, -1, -1):
        core_mat = cores[k].reshape(r[k] * n[k], r[k + 1])
        out = jnp.einsum('ijk,lj->ilk', out, core_mat)
        if k > 0:
            out = out.reshape(B, r[k], -1)
    return out.reshape(B, -1)


if __name__ == "__main__":
    # Module config: n (mode sizes), tt_config['r'] list with r[0] == 1,
    # sample_axis=True so hidden_dim() == r[-1] and forward takes an input.
    n = [4, 4, 4]            # N = 64
    r = [1, 8, 8, 32]        # TT ranks; hidden dim = 32
    B = 2
    d = len(n)

    key = jax.random.PRNGKey(0)
    keys = jax.random.split(key, d + 1)
    # Deterministic stand-in for cores[k].data.normal_(); shapes [r_k, n_k, r_{k+1}].
    cores = [jax.random.normal(keys[k], (r[k], n[k], r[k + 1]), jnp.float32)
             for k in range(d)]
    x = jax.random.normal(keys[d], (B, r[d]), jnp.float32)  # input: [batch, hidden]

    y_ref = np.asarray(tt_forward_ref(cores, x, n, r))

    # float32 path: strict check against the reference.
    y = np.asarray(jax.block_until_ready(tt_forward(cores, x, n, r)))
    np.testing.assert_allclose(y, y_ref, rtol=1e-5, atol=1e-5)
    assert y.shape == (B, int(np.prod(n)))

    # bf16-MXU / f32-accumulate path (v6e/v7x optimization): loose sanity check.
    y_bf16 = np.asarray(jax.block_until_ready(
        tt_forward(cores, x, n, r, compute_dtype=jnp.bfloat16)))
    rel = np.linalg.norm(y_bf16 - y_ref) / np.linalg.norm(y_ref)
    assert rel < 5e-2, f"bf16 relative error too large: {rel}"

    print("KERNEL_OK")
</pallas_src>

<mosaic_0001>
module attributes {stable_mosaic.version = 11 : i64} {
  func.func @kernel(%arg0: i32, %arg1: memref<32x2xf32, #tpu.memory_space<vmem>>, %arg2: memref<4x8xf32, #tpu.memory_space<vmem>>, %arg3: memref<4x8x8xf32, #tpu.memory_space<vmem>>, %arg4: memref<4x8x32xf32, #tpu.memory_space<vmem>>, %arg5: memref<1x4x32xf32, #tpu.memory_space<vmem>>, %arg6: memref<8x8xf32, #tpu.memory_space<vmem>>, %arg7: memref<8x32xf32, #tpu.memory_space<vmem>>) attributes {dimension_semantics = [#tpu.dimension_semantics<parallel>], iteration_bounds = array<i64: 1>, scalar_prefetch = 0 : i64, scratch_operands = 2 : i64, tpu.core_type = #tpu.core_type<tc>, window_params = [{transform_indices = @transform_0, window_bounds = array<i64: 32, 2>}, {pipeline_mode = #tpu.pipeline_mode<synchronous>, transform_indices = @transform_1, window_bounds = array<i64: 4, 8>}, {pipeline_mode = #tpu.pipeline_mode<synchronous>, transform_indices = @transform_2, window_bounds = array<i64: 4, 8, 8>}, {pipeline_mode = #tpu.pipeline_mode<synchronous>, transform_indices = @transform_3, window_bounds = array<i64: 4, 8, 32>}, {transform_indices = @transform_4, window_bounds = array<i64: 1, 4, 32>}]} {
    %c0 = arith.constant 0 : index
    %c0_0 = arith.constant 0 : index
    %0 = vector.load %arg1[%c0, %c0_0] : memref<32x2xf32, #tpu.memory_space<vmem>>, vector<32x2xf32>
    %c0_1 = arith.constant 0 : index
    %c0_2 = arith.constant 0 : index
    %c0_3 = arith.constant 0 : index
    %1 = vector.load %arg4[%c0_1, %c0_2, %c0_3] : memref<4x8x32xf32, #tpu.memory_space<vmem>>, vector<1x8x32xf32>
    %2 = vector.shape_cast %1 : vector<1x8x32xf32> to vector<8x32xf32>
    %cst = arith.constant dense<0.000000e+00> : vector<8x2xf32>
    %3 = tpu.matmul %2, %0, %cst {dimension_numbers = #tpu.dot_dimension_numbers<[1], [0], [0], [1], [0, 0, 1, 1], [], []>} : vector<8x32xf32>, vector<32x2xf32>, vector<8x2xf32> -> vector<8x2xf32>
    %c0_4 = arith.constant 0 : index
    %c0_5 = arith.constant 0 : index
    %4 = vector.load %arg6[%c0_4, %c0_5] : memref<8x8xf32, #tpu.memory_space<vmem>>, vector<8x2xf32>
    tpu.vector_store %arg6[%c0_4, %c0_5], %3 {strides = array<i32>} : memref<8x8xf32, #tpu.memory_space<vmem>>, vector<8x2xf32>,
    %c1 = arith.constant 1 : index
    %c0_6 = arith.constant 0 : index
    %c0_7 = arith.constant 0 : index
    %5 = vector.load %arg4[%c1, %c0_6, %c0_7] : memref<4x8x32xf32, #tpu.memory_space<vmem>>, vector<1x8x32xf32>
    %6 = vector.shape_cast %5 : vector<1x8x32xf32> to vector<8x32xf32>
    %cst_8 = arith.constant dense<0.000000e+00> : vector<8x2xf32>
    %7 = tpu.matmul %6, %0, %cst_8 {dimension_numbers = #tpu.dot_dimension_numbers<[1], [0], [0], [1], [0, 0, 1, 1], [], []>} : vector<8x32xf32>, vector<32x2xf32>, vector<8x2xf32> -> vector<8x2xf32>
    %c0_9 = arith.constant 0 : index
    %c2 = arith.constant 2 : index
    %8 = vector.load %arg6[%c0_9, %c2] : memref<8x8xf32, #tpu.memory_space<vmem>>, vector<8x2xf32>
    tpu.vector_store %arg6[%c0_9, %c2], %7 {strides = array<i32>} : memref<8x8xf32, #tpu.memory_space<vmem>>, vector<8x2xf32>,
    %c2_10 = arith.constant 2 : index
    %c0_11 = arith.constant 0 : index
    %c0_12 = arith.constant 0 : index
    %9 = vector.load %arg4[%c2_10, %c0_11, %c0_12] : memref<4x8x32xf32, #tpu.memory_space<vmem>>, vector<1x8x32xf32>
    %10 = vector.shape_cast %9 : vector<1x8x32xf32> to vector<8x32xf32>
    %cst_13 = arith.constant dense<0.000000e+00> : vector<8x2xf32>
    %11 = tpu.matmul %10, %0, %cst_13 {dimension_numbers = #tpu.dot_dimension_numbers<[1], [0], [0], [1], [0, 0, 1, 1], [], []>} : vector<8x32xf32>, vector<32x2xf32>, vector<8x2xf32> -> vector<8x2xf32>
    %c0_14 = arith.constant 0 : index
    %c4 = arith.constant 4 : index
    %12 = vector.load %arg6[%c0_14, %c4] : memref<8x8xf32, #tpu.memory_space<vmem>>, vector<8x2xf32>
    tpu.vector_store %arg6[%c0_14, %c4], %11 {strides = array<i32>} : memref<8x8xf32, #tpu.memory_space<vmem>>, vector<8x2xf32>,
    %c3 = arith.constant 3 : index
    %c0_15 = arith.constant 0 : index
    %c0_16 = arith.constant 0 : index
    %13 = vector.load %arg4[%c3, %c0_15, %c0_16] : memref<4x8x32xf32, #tpu.memory_space<vmem>>, vector<1x8x32xf32>
    %14 = vector.shape_cast %13 : vector<1x8x32xf32> to vector<8x32xf32>
    %cst_17 = arith.constant dense<0.000000e+00> : vector<8x2xf32>
    %15 = tpu.matmul %14, %0, %cst_17 {dimension_numbers = #tpu.dot_dimension_numbers<[1], [0], [0], [1], [0, 0, 1, 1], [], []>} : vector<8x32xf32>, vector<32x2xf32>, vector<8x2xf32> -> vector<8x2xf32>
    %c0_18 = arith.constant 0 : index
    %c6 = arith.constant 6 : index
    %16 = vector.load %arg6[%c0_18, %c6] : memref<8x8xf32, #tpu.memory_space<vmem>>, vector<8x2xf32>
    tpu.vector_store %arg6[%c0_18, %c6], %15 {strides = array<i32>} : memref<8x8xf32, #tpu.memory_space<vmem>>, vector<8x2xf32>,
    %c0_19 = arith.constant 0 : index
    %c0_20 = arith.constant 0 : index
    %17 = vector.load %arg6[%c0_19, %c0_20] : memref<8x8xf32, #tpu.memory_space<vmem>>, vector<8x8xf32>
    %c0_21 = arith.constant 0 : index
    %c0_22 = arith.constant 0 : index
    %c0_23 = arith.constant 0 : index
    %18 = vector.load %arg3[%c0_21, %c0_22, %c0_23] : memref<4x8x8xf32, #tpu.memory_space<vmem>>, vector<1x8x8xf32>
    %19 = vector.shape_cast %18 : vector<1x8x8xf32> to vector<8x8xf32>
    %cst_24 = arith.constant dense<0.000000e+00> : vector<8x8xf32>
    %20 = tpu.matmul %19, %17, %cst_24 {dimension_numbers = #tpu.dot_dimension_numbers<[1], [0], [0], [1], [0, 0, 1, 1], [], []>} : vector<8x8xf32>, vector<8x8xf32>, vector<8x8xf32> -> vector<8x8xf32>
    %c0_25 = arith.constant 0 : index
    %c0_26 = arith.constant 0 : index
    %21 = vector.load %arg7[%c0_25, %c0_26] : memref<8x32xf32, #tpu.memory_space<vmem>>, vector<8x8xf32>
    tpu.vector_store %arg7[%c0_25, %c0_26], %20 {strides = array<i32>} : memref<8x32xf32, #tpu.memory_space<vmem>>, vector<8x8xf32>,
    %c1_27 = arith.constant 1 : index
    %c0_28 = arith.constant 0 : index
    %c0_29 = arith.constant 0 : index
    %22 = vector.load %arg3[%c1_27, %c0_28, %c0_29] : memref<4x8x8xf32, #tpu.memory_space<vmem>>, vector<1x8x8xf32>
    %23 = vector.shape_cast %22 : vector<1x8x8xf32> to vector<8x8xf32>
    %cst_30 = arith.constant dense<0.000000e+00> : vector<8x8xf32>
    %24 = tpu.matmul %23, %17, %cst_30 {dimension_numbers = #tpu.dot_dimension_numbers<[1], [0], [0], [1], [0, 0, 1, 1], [], []>} : vector<8x8xf32>, vector<8x8xf32>, vector<8x8xf32> -> vector<8x8xf32>
    %c0_31 = arith.constant 0 : index
    %c8 = arith.constant 8 : index
    %25 = vector.load %arg7[%c0_31, %c8] : memref<8x32xf32, #tpu.memory_space<vmem>>, vector<8x8xf32>
    tpu.vector_store %arg7[%c0_31, %c8], %24 {strides = array<i32>} : memref<8x32xf32, #tpu.memory_space<vmem>>, vector<8x8xf32>,
    %c2_32 = arith.constant 2 : index
    %c0_33 = arith.constant 0 : index
    %c0_34 = arith.constant 0 : index
    %26 = vector.load %arg3[%c2_32, %c0_33, %c0_34] : memref<4x8x8xf32, #tpu.memory_space<vmem>>, vector<1x8x8xf32>
    %27 = vector.shape_cast %26 : vector<1x8x8xf32> to vector<8x8xf32>
    %cst_35 = arith.constant dense<0.000000e+00> : vector<8x8xf32>
    %28 = tpu.matmul %27, %17, %cst_35 {dimension_numbers = #tpu.dot_dimension_numbers<[1], [0], [0], [1], [0, 0, 1, 1], [], []>} : vector<8x8xf32>, vector<8x8xf32>, vector<8x8xf32> -> vector<8x8xf32>
    %c0_36 = arith.constant 0 : index
    %c16 = arith.constant 16 : index
    %29 = vector.load %arg7[%c0_36, %c16] : memref<8x32xf32, #tpu.memory_space<vmem>>, vector<8x8xf32>
    tpu.vector_store %arg7[%c0_36, %c16], %28 {strides = array<i32>} : memref<8x32xf32, #tpu.memory_space<vmem>>, vector<8x8xf32>,
    %c3_37 = arith.constant 3 : index
    %c0_38 = arith.constant 0 : index
    %c0_39 = arith.constant 0 : index
    %30 = vector.load %arg3[%c3_37, %c0_38, %c0_39] : memref<4x8x8xf32, #tpu.memory_space<vmem>>, vector<1x8x8xf32>
    %31 = vector.shape_cast %30 : vector<1x8x8xf32> to vector<8x8xf32>
    %cst_40 = arith.constant dense<0.000000e+00> : vector<8x8xf32>
    %32 = tpu.matmul %31, %17, %cst_40 {dimension_numbers = #tpu.dot_dimension_numbers<[1], [0], [0], [1], [0, 0, 1, 1], [], []>} : vector<8x8xf32>, vector<8x8xf32>, vector<8x8xf32> -> vector<8x8xf32>
    %c0_41 = arith.constant 0 : index
    %c24 = arith.constant 24 : index
    %33 = vector.load %arg7[%c0_41, %c24] : memref<8x32xf32, #tpu.memory_space<vmem>>, vector<8x8xf32>
    tpu.vector_store %arg7[%c0_41, %c24], %32 {strides = array<i32>} : memref<8x32xf32, #tpu.memory_space<vmem>>, vector<8x8xf32>,
    %c0_42 = arith.constant 0 : index
    %c0_43 = arith.constant 0 : index
    %34 = vector.load %arg7[%c0_42, %c0_43] : memref<8x32xf32, #tpu.memory_space<vmem>>, vector<8x32xf32>
    %c0_44 = arith.constant 0 : index
    %c0_45 = arith.constant 0 : index
    %35 = vector.load %arg2[%c0_44, %c0_45] : memref<4x8xf32, #tpu.memory_space<vmem>>, vector<4x8xf32>
    %cst_46 = arith.constant dense<0.000000e+00> : vector<4x32xf32>
    %36 = tpu.matmul %35, %34, %cst_46 {dimension_numbers = #tpu.dot_dimension_numbers<[1], [0], [0], [1], [0, 0, 1, 1], [], []>} : vector<4x8xf32>, vector<8x32xf32>, vector<4x32xf32> -> vector<4x32xf32>
    %c0_47 = arith.constant 0 : index
    %c0_48 = arith.constant 0 : index
    %c0_49 = arith.constant 0 : index
    %37 = vector.load %arg5[%c0_47, %c0_48, %c0_49] : memref<1x4x32xf32, #tpu.memory_space<vmem>>, vector<1x4x32xf32>
    %38 = vector.shape_cast %37 : vector<1x4x32xf32> to vector<4x32xf32>
    %39 = vector.shape_cast %36 : vector<4x32xf32> to vector<1x4x32xf32>
    tpu.vector_store %arg5[%c0_47, %c0_48, %c0_49], %39 {strides = array<i32>} : memref<1x4x32xf32, #tpu.memory_space<vmem>>, vector<1x4x32xf32>,
    return
  }
  func.func @transform_0(%arg0: i32) -> (i32, i32) {
    %c0_i32 = arith.constant 0 : i32
    %c0_i32_0 = arith.constant 0 : i32
    return %c0_i32, %arg0 : i32, i32
  }
  func.func @transform_1(%arg0: i32) -> (i32, i32) {
    %c0_i32 = arith.constant 0 : i32
    %c0_i32_0 = arith.constant 0 : i32
    %c0_i32_1 = arith.constant 0 : i32
    return %c0_i32, %c0_i32_0 : i32, i32
  }
  func.func @transform_2(%arg0: i32) -> (i32, i32, i32) {
    %c0_i32 = arith.constant 0 : i32
    %c0_i32_0 = arith.constant 0 : i32
    %c0_i32_1 = arith.constant 0 : i32
    %c0_i32_2 = arith.constant 0 : i32
    return %c0_i32, %c0_i32_0, %c0_i32_1 : i32, i32, i32
  }
  func.func @transform_3(%arg0: i32) -> (i32, i32, i32) {
    %c0_i32 = arith.constant 0 : i32
    %c0_i32_0 = arith.constant 0 : i32
    %c0_i32_1 = arith.constant 0 : i32
    %c0_i32_2 = arith.constant 0 : i32
    return %c0_i32, %c0_i32_0, %c0_i32_1 : i32, i32, i32
  }
  func.func @transform_4(%arg0: i32) -> (i32, i32, i32) {
    %c0_i32 = arith.constant 0 : i32
    %c0_i32_0 = arith.constant 0 : i32
    %c0_i32_1 = arith.constant 0 : i32
    return %arg0, %c0_i32, %c0_i32_0 : i32, i32, i32
  }
}

</mosaic_0001>

<bundles_post_ra>
// kernel: tpu_custom_call.1
= control target key start
LH: loop header
LB: loop body
LE: loop exit
PB: predicated region body
PF: predicated region fallthrough
CT: control target
= control target key end

     0   :  { %9 = vsyncpa [#allocation5], 0  ;;  %s513_s0 = inlined_call_operand.vmem [shape: f32[32,2], index: 0, kind: input, shape index: {}]   ;;  %s514_s1 = inlined_call_operand.hbm [shape: f32[4,8], index: 1, kind: input, shape index: {}]   ;;  %s515_s2 = inlined_call_operand.vmem [shape: f32[4,8,8], index: 2, kind: input, shape index: {}]   ;;  %s516_s3 = inlined_call_operand.hbm [shape: f32[4,8,32], index: 3, kind: input, shape index: {}]   ;;  %s517_s4 = inlined_call_operand.hbm [shape: f32[1,4,32], index: 4, kind: output, shape index: {}]  }
   0x1   :  { %10 = vsyncpa [#allocation8], 0 }
   0x2   :  { %11 = vsyncpa [#allocation6], 0  ;;  %s19_s17 = sshll.u32 %s514_s1, 4  ;;  %s437_s18 = smov [#allocation4]   ;;  %s20_s17 = int_to_ptr.hbm [resolvable:$true] %s19_s17 }
   0x3   :  { %s21_s19 = sshll.u32 %s437_s18, 4  ;;  %s31_s22 = sshll.u32 %s516_s3, 4  ;;  %s22_s19 = int_to_ptr.vmem [resolvable:$true] %s21_s19  ;;  %s32_s22 = int_to_ptr.hbm [resolvable:$true] %s31_s22 }
   0x4   :  { %24 = dma.hbm_to_vmem [thread:$0]  %s20_s17, 64, %s22_s19, [#allocation5]  }
   0x5   :  { %s438_s23 = smov [#allocation7]   ;;  %s439_s25 = smov 128  }
   0x6   :  { %s33_s24 = sshll.u32 %s438_s23, 4  ;;  %s440_s26 = smov 8   ;;  %s34_s24 = int_to_ptr.vmem [resolvable:$true] %s33_s24 }
   0x7   :  { %39 = dma.hbm_to_vmem [thread:$0]  %s32_s22, 512, %s34_s24, [#allocation8], %s439_s25, %s439_s25, %s440_s26  }
   0x8   :  { %431 = dma.done.wait [#allocation5], 64  }
   0x9   :  { %432 = vsyncadd [#allocation5], 4294967232 }
   0xa   :  { %433 = dma.done.wait [#allocation8], 512  }
   0xb   :  { %434 = vsyncadd [#allocation8], 4294966784  ;;  %v51_v0 = vld [vmem:[%s513_s0 + $0x18] sm:$0xff]  ;;  %v50_v1 = vld [vmem:[%s513_s0 + $0x10] sm:$0xff]  ;;  %vm53_vm0 = vcmask 261120   ;;  %vm77_vm1 = vcmask 15360  }
   0xc   :  { %96 = vmatpush.msra.mxu1 %v51_v0  ;;  %127 = vmatpush.msra.mxu2 %v51_v0  ;;  %v49_v2 = vld [vmem:[%s513_s0 + $0x8] sm:$0xff]  ;;  %v48_v3 = vld [vmem:[%s513_s0] sm:$0xff]  ;;  %v52_v7 = vld [vmem:[#allocation7] sm:$0xff]  ;;  %s441_s0 = smov 2   ;;  %s442_s7 = smov 4   ;;  %vm108_vm2 = vcmask 31760  }
   0xd   :  { %158 = vmatpush.msra.mxu3 %v51_v0  ;;  %69 = vmatpush.msra.mxu0 %v51_v0  ;;  %v80_v4 = vld [vmem:[#allocation7 + $0x8] sm:$0xff]  ;;  %v111_v5 = vld [vmem:[#allocation7 + $0x10] sm:$0xff]  ;;  %v142_v6 = vld [vmem:[#allocation7 + $0x18] sm:$0xff]  ;;  %s443_s8 = smov 6   ;;  %vm139_vm3 = vcmask 48160   ;;  %vm170_vm4 = vcmask 64560  }
   0xe   :  { %97 = vmatpush.msra.mxu1 %v50_v1  ;;  %128 = vmatpush.msra.mxu2 %v50_v1  ;;  %vm174_vm5 = vcmask 64512   ;;  %v342_v16 = vld [vmem:[%s515_s2 + $0x8] sm:$0xff]  ;;  %v344_v17 = vld [vmem:[%s515_s2 + $0x10] sm:$0xff]  ;;  %v346_v18 = vld [vmem:[%s515_s2 + $0x18] sm:$0xff]  ;;  %s444_s17 = smov 16   ;;  %s445_s18 = smov 24  }
   0xf   :  { %159 = vmatpush.msra.mxu3 %v50_v1  ;;  %70 = vmatpush.msra.mxu0 %v50_v1  ;;  %v173_v19 = vld [vmem:[%s515_s2] sm:$0xff]  ;;  %vm228_vm6 = vcmask 130112   ;;  %vm259_vm7 = vcmask 195712   ;;  %vm290_vm8 = vcmask 261312   ;;  %v293_v27 = vld [vmem:[#allocation4] sm:$0xf] }
  0x10   :  { %98 = vmatpush.msra.mxu1 %v49_v2  ;;  %129 = vmatpush.msra.mxu2 %v49_v2  ;;  %s446_s2 = smov [#allocation9]   ;;  %s326_s22 = sshll.u32 %s517_s4, 4  ;;  %vm317_vm9 = vcmask 257024   ;;  %s327_s22 = int_to_ptr.hbm [resolvable:$true] %s326_s22 }
  0x11   :  { %160 = vmatpush.msra.mxu3 %v49_v2  ;;  %71 = vmatpush.msra.mxu0 %v49_v2  ;;  %s324_s19 = sshll.u32 %s446_s2, 4  ;;  %s325_s19 = int_to_ptr.vmem [resolvable:$true] %s324_s19 }
  0x12   :  { %99 = vmatpush.msra.mxu1 %v48_v3  ;;  %130 = vmatpush.msra.mxu2 %v48_v3 }
  0x13   :  { %338 = vmatmul.msk.f32.vlgmr.msra.gmra.mxu1 %vm53_vm0, %v80_v4  ;;  %339 = vmatmul.msk.f32.vlgmr.msra.gmra.mxu2 %vm53_vm0, %v111_v5 }
  0x14   :  { %161 = vmatpush.msra.mxu3 %v48_v3  ;;  %72 = vmatpush.msra.mxu0 %v48_v3 }
  0x15   :  { %340 = vmatmul.msk.f32.vlgmr.msra.gmra.mxu3 %vm53_vm0, %v142_v6  ;;  %337 = vmatmul.msk.f32.vlgmr.msra.gmra.mxu0 %vm53_vm0, %v52_v7 }
  0x90   :  { %v101_v8 = vpop.f32.mrf.mxu1 }
  0x91   :  { %105 = vrot.lane.b32.xlu0 %v101_v8, %s441_s0 }
  0x92   :  { %v74_v9 = vpop.f32.mrf.mxu0 }
  0x93   :  { %78 = vst.msk [vmem:[#allocation2] sm:$0xff] %vm77_vm1, %v74_v9 }
  0x96   :  { %v132_v10 = vpop.f32.mrf.mxu2 }
  0x98   :  { %v163_v11 = vpop.f32.mrf.mxu3 }
  0x99   :  { %136 = vrot.lane.b32.xlu0 %v132_v10, %s442_s7  ;;  %167 = vrot.lane.b32.xlu1 %v163_v11, %s443_s8 }
 0x103   :  { %v106_v12 = vpop.permute.xlu0 %105 }
 0x104   :  { %109 = vst.msk [vmem:[#allocation2] sm:$0xff] %vm108_vm2, %v106_v12 }
 0x10b   :  { %v137_v13 = vpop.permute.xlu0 %136  ;;  %v168_v14 = vpop.permute.xlu1 %167 }
 0x10c   :  { %140 = vst.msk [vmem:[#allocation2] sm:$0xff] %vm139_vm3, %v137_v13 }
 0x10d   :  { %171 = vst.msk [vmem:[#allocation2] sm:$0xff] %vm170_vm4, %v168_v14 }
 0x114   :  { %v172_v15 = vld [vmem:[#allocation2] sm:$0xff] }
 0x115   :  { %193 = vmatpush.msrb.mxu0 %v172_v15  ;;  %219 = vmatpush.msrb.mxu1 %v172_v15 }
 0x116   :  { %250 = vmatpush.msrb.mxu2 %v172_v15  ;;  %281 = vmatpush.msrb.mxu3 %v172_v15 }
 0x117   :  { %343 = vmatmul.msk.f32.vlgmr.msrb.gmra.mxu1 %vm174_vm5, %v342_v16  ;;  %345 = vmatmul.msk.f32.vlgmr.msrb.gmra.mxu2 %vm174_vm5, %v344_v17 }
 0x118   :  { %347 = vmatmul.msk.f32.vlgmr.msrb.gmra.mxu3 %vm174_vm5, %v346_v18  ;;  %341 = vmatmul.msk.f32.vlgmr.msrb.gmra.mxu0 %vm174_vm5, %v173_v19 }
 0x194   :  { %v221_v20 = vpop.f32.mrf.mxu1 }
 0x195   :  { %225 = vrot.lane.b32.xlu1 %v221_v20, %s440_s26  ;;  %v195_v23 = vpop.f32.mrf.mxu0 }
 0x196   :  { %198 = vst.msk [vmem:[#allocation3] sm:$0xff] %vm174_vm5, %v195_v23 }
 0x19a   :  { %v252_v21 = vpop.f32.mrf.mxu2 }
 0x19b   :  { %256 = vrot.lane.b32.xlu2 %v252_v21, %s444_s17  ;;  %v283_v22 = vpop.f32.mrf.mxu3 }
 0x1a3   :  { %287 = vrot.lane.b32.xlu2 %v283_v22, %s445_s18 }
 0x1f5   :  { %v257_v24 = vpop.permute.xlu2 %256 }
 0x1fd   :  { %v288_v26 = vpop.permute.xlu2 %287 }
 0x207   :  { %v226_v25 = vpop.permute.xlu1 %225 }
 0x208   :  { %229 = vst.msk [vmem:[#allocation3] sm:$0xff] %vm228_vm6, %v226_v25 }
 0x209   :  { %260 = vst.msk [vmem:[#allocation3] sm:$0xff] %vm259_vm7, %v257_v24 }
 0x20a   :  { %291 = vst.msk [vmem:[#allocation3] sm:$0xff] %vm290_vm8, %v288_v26 }
 0x211   :  { %v292_v28 = vld [vmem:[#allocation3] sm:$0xff] }
 0x212   :  { %312 = vmatpush.msra.mxu0 %v292_v28 }
 0x213   :  { %348 = vmatmul.msk.f32.vlgmr.msra.gmra.mxu0 %vm174_vm5, %v293_v27 }
 0x290   :  { %v314_v29 = vpop.f32.mrf.mxu0 }
 0x291   :  { %318 = vst.msk [vmem:[#allocation9] sm:$0xf] %vm317_vm9, %v314_v29 }
 0x292   :  { %329 = dma.vmem_to_hbm [thread:$0]  %s325_s19, 64, %s327_s22, [#allocation6]  }
 0x293   :  { %435 = dma.done.wait [#allocation6], 64  }
 0x294   :  { %436 = vsyncadd [#allocation6], 4294967232 }
 0x295   :  { %334 = vsyncpa [#allocation5], 1 }
 0x296   :  { %335 = vsyncpa [#allocation8], 1 }
 0x297   :  { %336 = vsyncpa [#allocation6], 1 }

</bundles_post_ra>
